<compile_context>
chip_gen: v7x
topology: tpu7x:2x2x1
jax: 0.10.0
libtpu: 0.0.40
codegen_flags: <defaults>
</compile_context>

<pallas_src>
import jax
import jax.numpy as jnp
from jax.experimental import pallas as pl
from jax.experimental.pallas import tpu as pltpu


def distnet_kernel(w_ref, b_ref, x_ref, o_ref):
    # w_ref: SMEM (3,) f32, b_ref: SMEM (1,) f32
    # x_ref: VMEM (3, TILE_B), o_ref: VMEM (1, TILE_B) f32
    x = x_ref[...].astype(jnp.float32)            # upcast in-kernel (bf16 ok)
    z = (w_ref[0] * x[0:1, :]
         + w_ref[1] * x[1:2, :]
         + w_ref[2] * x[2:3, :]
         + b_ref[0])                              # (1, TILE_B)
    o_ref[...] = jax.nn.sigmoid(z).astype(o_ref.dtype)


def distnet_forward(x, weight, bias, *, tile_b=None):
    """Forward pass of DistNet_t.

    x:      any shape whose total size is divisible by 3 (reshaped to (-1, 3)),
            any float dtype (bf16 is kept bf16 over the HBM read).
    weight: (1, 3) float (PyTorch nn.Linear layout)
    bias:   (1,)   float
    Returns: (B, 1) float32 where B = x.size // 3
    """
    x2 = jnp.reshape(x, (-1, 3))
    B = x2.shape[0]

    # Tile size: multiple of 128 (lane-dense), large enough to amortize the
    # ~0.35us per-grid-step overhead, small enough that double-buffered
    # (3, TILE_B) + (1, TILE_B) f32 blocks stay ~4 MiB (fits every generation).
    if tile_b is None:
        tile_b = min(32768, 128 * pl.cdiv(B, 128))
    num_tiles = pl.cdiv(B, tile_b)
    b_pad = num_tiles * tile_b

    # Lane-dense input: (3, B_pad), batch on the lane axis.
    x_pad = jnp.pad(x2, ((0, b_pad - B), (0, 0)))
    x_t = x_pad.T                                  # (3, B_pad)

    w_flat = jnp.reshape(weight, (3,)).astype(jnp.float32)
    b_flat = jnp.reshape(bias, (1,)).astype(jnp.float32)

    out = pl.pallas_call(
        distnet_kernel,
        out_shape=jax.ShapeDtypeStruct((1, b_pad), jnp.float32),
        grid=(num_tiles,),
        in_specs=[
            pl.BlockSpec(memory_space=pltpu.MemorySpace.SMEM),   # weight (3,)
            pl.BlockSpec(memory_space=pltpu.MemorySpace.SMEM),   # bias (1,)
            pl.BlockSpec((3, tile_b), lambda i: (0, i)),         # x (3, B_pad)
        ],
        out_specs=pl.BlockSpec((1, tile_b), lambda i: (0, i)),
        compiler_params=pltpu.CompilerParams(
            dimension_semantics=("parallel",),       # megacore on v7x
            vmem_limit_bytes=32 * 1024 * 1024,
        ),
    )(w_flat, b_flat, x_t)

    return out[0, :B].reshape(B, 1)


def init_params(key):
    """Deterministic init matching nn.Linear(3, 1) default: U(-1/sqrt(3), 1/sqrt(3))."""
    kw, kb = jax.random.split(key)
    bound = 1.0 / jnp.sqrt(3.0)
    weight = jax.random.uniform(kw, (1, 3), jnp.float32, -bound, bound)
    bias = jax.random.uniform(kb, (1,), jnp.float32, -bound, bound)
    return weight, bias


if __name__ == "__main__":
    key = jax.random.PRNGKey(0)
    k_param, k_x = jax.random.split(key)

    weight, bias = init_params(k_param)

    # Batched input of shape [8, 3] (module also accepts [3]; it reshapes to (-1, 3))
    x = jax.random.normal(k_x, (8, 3), dtype=jnp.float32)

    y = distnet_forward(x, weight, bias)
    y = jax.block_until_ready(y)

    # Reference check in plain JAX
    ref = jax.nn.sigmoid(jnp.reshape(x, (-1, 3)) @ weight.T + bias)
    assert y.shape == (8, 1), y.shape
    assert jnp.allclose(y, ref, atol=1e-6, rtol=1e-6)

    print("KERNEL_OK")
</pallas_src>

<mosaic_0001>
module attributes {stable_mosaic.version = 11 : i64} {
  func.func @distnet_kernel(%arg0: i32, %arg1: memref<3xf32, #tpu.memory_space<smem>>, %arg2: memref<1xf32, #tpu.memory_space<smem>>, %arg3: memref<3x128xf32, #tpu.memory_space<vmem>>, %arg4: memref<1x128xf32, #tpu.memory_space<vmem>>) attributes {dimension_semantics = [#tpu.dimension_semantics<parallel>], iteration_bounds = array<i64: 1>, scalar_prefetch = 0 : i64, scratch_operands = 0 : i64, tpu.core_type = #tpu.core_type<tc>, window_params = [{transform_indices = @transform_0, window_bounds = array<i64: 3>}, {transform_indices = @transform_1, window_bounds = array<i64: 1>}, {transform_indices = @transform_2, window_bounds = array<i64: 3, 128>}, {transform_indices = @transform_3, window_bounds = array<i64: 1, 128>}]} {
    %c0 = arith.constant 0 : index
    %c0_0 = arith.constant 0 : index
    %0 = vector.load %arg3[%c0, %c0_0] : memref<3x128xf32, #tpu.memory_space<vmem>>, vector<3x128xf32>
    %c0_1 = arith.constant 0 : index
    %1 = memref.load %arg1[%c0_1] : memref<3xf32, #tpu.memory_space<smem>>
    %2 = vector.extract_strided_slice %0 {offsets = [0, 0], sizes = [1, 128], strides = [1, 1]} : vector<3x128xf32> to vector<1x128xf32>
    %3 = vector.broadcast %1 : f32 to vector<1x128xf32>
    %4 = arith.mulf %3, %2 : vector<1x128xf32>
    %c1 = arith.constant 1 : index
    %5 = memref.load %arg1[%c1] : memref<3xf32, #tpu.memory_space<smem>>
    %6 = vector.extract_strided_slice %0 {offsets = [1, 0], sizes = [1, 128], strides = [1, 1]} : vector<3x128xf32> to vector<1x128xf32>
    %7 = vector.broadcast %5 : f32 to vector<1x128xf32>
    %8 = arith.mulf %7, %6 : vector<1x128xf32>
    %9 = arith.addf %4, %8 : vector<1x128xf32>
    %c2 = arith.constant 2 : index
    %10 = memref.load %arg1[%c2] : memref<3xf32, #tpu.memory_space<smem>>
    %11 = vector.extract_strided_slice %0 {offsets = [2, 0], sizes = [1, 128], strides = [1, 1]} : vector<3x128xf32> to vector<1x128xf32>
    %12 = vector.broadcast %10 : f32 to vector<1x128xf32>
    %13 = arith.mulf %12, %11 : vector<1x128xf32>
    %14 = arith.addf %9, %13 : vector<1x128xf32>
    %c0_2 = arith.constant 0 : index
    %15 = memref.load %arg2[%c0_2] : memref<1xf32, #tpu.memory_space<smem>>
    %16 = vector.broadcast %15 : f32 to vector<1x128xf32>
    %17 = arith.addf %14, %16 : vector<1x128xf32>
    %18 = arith.negf %17 : vector<1x128xf32>
    %19 = math.exp %18 : vector<1x128xf32>
    %cst = arith.constant 1.000000e+00 : f32
    %20 = vector.broadcast %cst : f32 to vector<1x128xf32>
    %21 = arith.addf %20, %19 : vector<1x128xf32>
    %22 = arith.divf %20, %21 : vector<1x128xf32>
    %c0_3 = arith.constant 0 : index
    %c0_4 = arith.constant 0 : index
    %23 = vector.load %arg4[%c0_3, %c0_4] : memref<1x128xf32, #tpu.memory_space<vmem>>, vector<1x128xf32>
    tpu.vector_store %arg4[%c0_3, %c0_4], %22 {strides = array<i32>} : memref<1x128xf32, #tpu.memory_space<vmem>>, vector<1x128xf32>,
    return
  }
  func.func @transform_0(%arg0: i32) -> i32 {
    %c0_i32 = arith.constant 0 : i32
    %c0_i32_0 = arith.constant 0 : i32
    return %c0_i32 : i32
  }
  func.func @transform_1(%arg0: i32) -> i32 {
    %c0_i32 = arith.constant 0 : i32
    %c0_i32_0 = arith.constant 0 : i32
    return %c0_i32 : i32
  }
  func.func @transform_2(%arg0: i32) -> (i32, i32) {
    %c0_i32 = arith.constant 0 : i32
    %c0_i32_0 = arith.constant 0 : i32
    return %c0_i32, %arg0 : i32, i32
  }
  func.func @transform_3(%arg0: i32) -> (i32, i32) {
    %c0_i32 = arith.constant 0 : i32
    %c0_i32_0 = arith.constant 0 : i32
    return %c0_i32, %arg0 : i32, i32
  }
}

</mosaic_0001>

<bundles_post_ra>
// kernel: tpu_custom_call.1
= control target key start
LH: loop header
LB: loop body
LE: loop exit
PB: predicated region body
PF: predicated region fallthrough
CT: control target
= control target key end

     0   :  { %9 = vsyncpa [#allocation5], 0  ;;  %s162_s0 = inlined_call_operand.vmem [shape: f32[3], index: 0, kind: input, shape index: {}]   ;;  %s163_s1 = inlined_call_operand.<no memory space> [shape: f32[1], index: 1, kind: input, shape index: {}]   ;;  %s164_s2 = inlined_call_operand.vmem [shape: f32[3,128], index: 2, kind: input, shape index: {}]   ;;  %s165_s3 = inlined_call_operand.hbm [shape: f32[1,128], index: 3, kind: output, shape index: {}]  }
   0x1   :  { %10 = vsyncpa [#allocation4], 0  ;;  %s17_s14 = sshll.u32 %s162_s0, 4  ;;  %s18_s14 = int_to_ptr.vmem [resolvable:$true] %s17_s14 }
   0x2   :  { %s81_s15 = scalar_lea.vmem %s18_s14, 16  ;;  %p86_p1 = scmp.lt.s32.totalorder %s18_s14, %s18_s14 }
   0x3   :  { %p82_p0 = scmp.ne.s32.totalorder %s18_s14, %s81_s15  ;;  %p87_p2 = scmp.lt.s32.totalorder %s81_s15, %s81_s15 }
   0x5   :  { %p88_p3 = por %p87_p2, %p86_p1 }
   0x7   :  { %p89_p4 = pnand %p88_p3, %p82_p0 }
   0x9   :  { %92 = shalt.err (!%p89_p4)
}
   0xa   :  { %s119_s16 = smov [#allocation3]  }
   0xb   :  { %20 = dma.vmem_to_smem %s18_s14, 16, %s119_s16, [#allocation5]  }
   0xc   :  { %115 = dma.done.wait [#allocation5], 16  }
   0xd   :  { %116 = vsyncadd [#allocation5], 4294967280 }
   0xe   :  { %28 = sfence }
   0xf   :  { %s30_s17 = sld [smem:[#allocation3]]  ;;  %s72_s18 = sld [smem:[#allocation3 + $0x1]]  ;;  %v29_v0 = vld [vmem:[%s164_s2] sm:$0x7]  ;;  %v48_v10 = vstv %s163_s1 }
  0x10   :  { %s73_s19 = sld [smem:[#allocation3 + $0x2]]  ;;  %s120_s2 = smov [#allocation6]  }
  0x11   :  { %s63_s23 = sshll.u32 %s120_s2, 4  ;;  %s64_s23 = int_to_ptr.vmem [resolvable:$true] %s63_s23 }
  0x12   :  { %s93_s24 = scalar_lea.vmem %s64_s23, 16  ;;  %s97_s25 = scalar_lea.vmem %s64_s23, 32 }
  0x13   :  { %p94_p5 = scmp.ne.s32.totalorder %s64_s23, %s93_s24  ;;  %p98_p6 = scmp.lt.s32.totalorder %s64_s23, %s64_s23 }
  0x14   :  { %p99_p7 = scmp.lt.s32.totalorder %s97_s25, %s93_s24 }
  0x15   :  { %v31_v1 = vstv %s30_s17  ;;  %v34_v2 = vstv %s72_s18 }
  0x16   :  { %v32_v3 = vmul.f32 %v31_v1, %v29_v0  ;;  %v35_v4 = vmul.f32 %v34_v2, %v29_v0  ;;  %v41_v5 = vstv %s73_s19  ;;  %p100_p8 = por %p99_p7, %p98_p6 }
  0x17   :  { %v42_v6 = vmul.f32 %v41_v5, %v29_v0 }
  0x18   :  { %v37_v7 = vrot.slane %v35_v4, 1  ;;  %p101_p9 = pnand %p100_p8, %p94_p5 }
  0x19   :  { %v44_v8 = vrot.slane %v42_v6, 2 }
  0x1a   :  { %v39_v9 = vadd.f32 %v37_v7, %v32_v3 }
  0x1c   :  { %v46_v11 = vadd.f32 %v44_v8, %v39_v9 }
  0x1e   :  { %v49_v12 = vadd.f32 %v48_v10, %v46_v11 }
  0x20   :  { %v74_v13 = vmul.f32 -1.442695, %v49_v12 }
  0x22   :  { %77 = vpow2.f32 %v74_v13 }
  0x2c   :  { %v78_v14 = vpop.eup %77 }
  0x2d   :  { %v53_v15 = vadd.f32 1.0, %v78_v14 }
  0x2f   :  { %79 = vrcp.f32 %v53_v15 }
  0x39   :  { %v80_v16 = vpop.eup %79 }
  0x3a   :  { %56 = vst [vmem:[#allocation6] sm:$0x1] %v80_v16 }
  0x3b   :  { %104 = shalt.err (!%p101_p9)
}
  0x3c   :  { %s105_s27 = scalar_lea.hbm %s165_s3, 16 }
  0x3d   :  { %p106_p10 = scmp.ne.s32.totalorder %s165_s3, %s105_s27  ;;  %p109_p11 = scmp.lt.u32.totalorder %s105_s27, %s165_s3 }
  0x3f   :  { %p111_p12 = pnand %p109_p11, %p106_p10 }
  0x41   :  { %114 = shalt.err (!%p111_p12)
}
  0x42   :  { %66 = dma.vmem_to_hbm [thread:$0]  %s64_s23, 16, %s165_s3, [#allocation4]  }
  0x43   :  { %117 = dma.done.wait [#allocation4], 16  }
  0x44   :  { %118 = vsyncadd [#allocation4], 4294967280 }
  0x45   :  { %70 = vsyncpa [#allocation4], 1 }
  0x46   :  { %71 = vsyncpa [#allocation5], 1 }

</bundles_post_ra>
